<compile_context>
chip_gen: v6e
topology: v6e:2x2x1
jax: 0.10.0
libtpu: 0.0.40
codegen_flags: <defaults>
</compile_context>

<pallas_src>
import jax
import jax.numpy as jnp
from jax.experimental import pallas as pl
from jax.experimental.pallas import tpu as pltpu


def _attention_kernel(x_ref, w_ref, ctx_ref, attn_ref):
    # x_ref    : (Bt, S, H) VMEM  encoder-output tile, native (streaming) dtype
    # w_ref    : (1, H)     VMEM  projection weight row (resident across steps)
    # ctx_ref  : (1, Bt, H) VMEM  context vectors (lane-dense store)
    # attn_ref : (1, Bt, S) VMEM  attention weights (lane-dense store)
    bt, _, h = x_ref.shape
    x = x_ref[...]                                   # native dtype, no upcast
    w = jnp.broadcast_to(w_ref[...].reshape(1, 1, h), (bt, 1, h))   # (Bt,1,H)

    # Score matvec on the MXU with f32 accumulation; no full-tile f32 copy.
    # NOTE: the Linear bias is dropped — softmax is shift-invariant, so a
    # scalar bias has zero effect on either output.
    scores = jnp.einsum('boh,bsh->bos', w, x,
                        preferred_element_type=jnp.float32)          # (Bt,1,S)

    # Softmax over the sequence axis; all intermediates are small and f32.
    m = jnp.max(scores, axis=-1, keepdims=True)                      # (Bt,1,1)
    e = jnp.exp(scores - m)                                          # (Bt,1,S)
    denom = jnp.sum(e, axis=-1, keepdims=True)                       # (Bt,1,1)
    weights = e / denom        # exact divide: kernel is DMA-bound, so it's free

    # Weighted sum over S on the MXU: (Bt,1,S) @ (Bt,S,H) -> (Bt,1,H).
    ctx = jnp.einsum('bos,bsh->boh', weights.astype(x.dtype), x,
                     preferred_element_type=jnp.float32)             # (Bt,1,H)

    ctx_ref[0] = ctx[:, 0, :].astype(ctx_ref.dtype)                  # (Bt, H)
    attn_ref[0] = weights[:, 0, :].astype(attn_ref.dtype)            # (Bt, S)


def _vmem_capacity_bytes():
    """Per-core VMEM capacity; falls back to v7x (most restrictive modern gen)."""
    try:
        cap = getattr(pltpu.get_tpu_info(), "vmem_capacity_bytes", None)
        if cap:
            return int(cap)
    except Exception:
        pass
    return 64 * 1024 * 1024


def _choose_batch_tile(batch, seq, hidden, itemsize, vmem_cap):
    """Batch elements per grid step (generation-aware, non-divisor friendly)."""
    row_bytes = max(1, seq * hidden * itemsize)
    # Each input buffer (the pipeline double-buffers it) gets ~1/4 of VMEM,
    # leaving the other half for outputs, the weight and f32 intermediates.
    max_bt = max(1, (vmem_cap // 4) // row_bytes)
    bt = min(batch, max_bt)
    # Prefer >= 4 grid steps (2 per v7x TensorCore -> per-core DMA/compute
    # overlap) as long as the per-step tile stays above ~2 MiB.
    min_tile_bytes = 2 * 1024 * 1024
    for steps in (4, 2):
        cand = max(1, pl.cdiv(batch, steps))
        if cand < bt and cand * row_bytes >= min_tile_bytes:
            return cand
    # Tiny problems: still take >= 2 steps when possible so the "parallel"
    # batch axis can shard across both cores.
    if bt == batch and batch >= 2:
        return max(1, pl.cdiv(batch, 2))
    return bt


def attention_forward(hidden, encoder_outputs, w, b=None, *, stream_dtype=None):
    """Mirror of Attention.forward(hidden, encoder_outputs).

    `hidden` is unused by the PyTorch forward; the Linear bias `b` is a
    mathematical no-op under the softmax (shift invariance) and is ignored.
    encoder_outputs: (B, S, H)
    w: torch Linear(hidden_dim, 1) weight, any of (H, 1) / (1, H) / (H,)
    stream_dtype: optionally cast encoder_outputs (e.g. to jnp.bfloat16) at
        the pallas_call boundary — the kernel is HBM-bandwidth bound, so
        halving the streamed bytes is a ~2x wall-clock win.
    Returns (context_vector (B, H), attn_weights (B, S, 1)).
    """
    del hidden, b
    if stream_dtype is not None:
        encoder_outputs = encoder_outputs.astype(stream_dtype)

    B, S, H = encoder_outputs.shape
    dtype = encoder_outputs.dtype
    itemsize = jnp.dtype(dtype).itemsize

    w_row = jnp.asarray(w).reshape(1, H).astype(dtype)   # lane-dense weight row

    vmem_cap = _vmem_capacity_bytes()
    bt = _choose_batch_tile(B, S, H, itemsize, vmem_cap)
    nb = pl.cdiv(B, bt)
    b_pad = nb * bt

    x_in = encoder_outputs
    if b_pad != B:
        # Ragged final block handled by zero-padding; padded rows produce
        # uniform attention over zeros and are sliced off below.
        x_in = jnp.concatenate(
            [encoder_outputs, jnp.zeros((b_pad - B, S, H), dtype=dtype)], axis=0)

    # Generation-aware scoped-VMEM limit: enough for the double-buffered tiles
    # plus intermediates, with headroom under the physical cap (64 MiB v7x,
    # 128 MiB v5e/v6e).
    footprint = (2 * bt * S * H * itemsize          # double-buffered input tile
                 + 2 * bt * (S + H) * itemsize      # double-buffered outputs
                 + 2 * H * itemsize                 # resident weight row
                 + 8 * bt * (S + H))                # f32 intermediates (generous)
    vmem_limit = int(min(vmem_cap * 7 // 8,
                         max(2 * footprint, 32 * 1024 * 1024)))

    flops = int(4 * B * S * H)                      # score matvec + weighted sum
    bytes_accessed = int(itemsize * (b_pad * S * H + b_pad * (S + H) + H))

    ctx3, attn3 = pl.pallas_call(
        _attention_kernel,
        out_shape=(
            jax.ShapeDtypeStruct((nb, bt, H), dtype),
            jax.ShapeDtypeStruct((nb, bt, S), dtype),
        ),
        grid_spec=pltpu.PrefetchScalarGridSpec(
            num_scalar_prefetch=0,
            grid=(nb,),
            in_specs=[
                pl.BlockSpec((bt, S, H), lambda i: (i, 0, 0)),   # encoder outputs
                pl.BlockSpec((1, H), lambda i: (0, 0)),          # weight (resident)
            ],
            out_specs=(
                pl.BlockSpec((1, bt, H), lambda i: (i, 0, 0)),   # context
                pl.BlockSpec((1, bt, S), lambda i: (i, 0, 0)),   # attn weights
            ),
        ),
        compiler_params=pltpu.CompilerParams(
            dimension_semantics=("parallel",),
            vmem_limit_bytes=vmem_limit),
        cost_estimate=pl.CostEstimate(
            flops=flops, transcendentals=int(B * S),
            bytes_accessed=bytes_accessed),
    )(x_in, w_row)

    context = ctx3.reshape(b_pad, H)[:B]
    attn_weights = attn3.reshape(b_pad, S, 1)[:B]
    return context, attn_weights


def _reference(encoder_outputs, w, b):
    H = encoder_outputs.shape[-1]
    scores = encoder_outputs @ jnp.asarray(w).reshape(H, 1) + jnp.asarray(b).reshape(())
    weights = jax.nn.softmax(scores, axis=1)                       # (B, S, 1)
    context = jnp.sum(weights * encoder_outputs, axis=1)           # (B, H)
    return context, weights


if __name__ == "__main__":
    B, S, H = 2, 8, 32

    key = jax.random.PRNGKey(0)
    k_x, k_h, k_w, k_b = jax.random.split(key, 4)

    encoder_outputs = jax.random.normal(k_x, (B, S, H), dtype=jnp.float32)
    hidden_state = jax.random.normal(k_h, (B, H), dtype=jnp.float32)  # unused by forward

    # Deterministic init of nn.Linear(hidden_dim, 1): weight (1, H), bias (1,)
    # (uniform in [-1/sqrt(H), 1/sqrt(H)], like torch's default init).
    bound = 1.0 / (H ** 0.5)
    w_torch = jax.random.uniform(k_w, (1, H), minval=-bound, maxval=bound,
                                 dtype=jnp.float32)
    b_torch = jax.random.uniform(k_b, (1,), minval=-bound, maxval=bound,
                                 dtype=jnp.float32)

    w = w_torch.T                       # (H, 1), as stored by torch Linear (transposed)
    b = b_torch.reshape(1, 1)           # (1, 1) — no-op under softmax, kept for parity

    ctx, attn = attention_forward(hidden_state, encoder_outputs, w, b)
    jax.block_until_ready((ctx, attn))

    ctx_ref, attn_ref = _reference(encoder_outputs, w, b)
    assert ctx.shape == (B, H) and attn.shape == (B, S, 1)
    # MXU matmul precision for f32 operands may differ slightly from the XLA
    # reference path -> percent-level tolerance for this smoke test.
    assert jnp.allclose(ctx, ctx_ref, atol=1e-2, rtol=1e-2)
    assert jnp.allclose(attn, attn_ref, atol=1e-2, rtol=1e-2)

    print("KERNEL_OK")
</pallas_src>

<mosaic_0001>
module attributes {stable_mosaic.version = 11 : i64} {
  func.func @_attention_kernel(%arg0: i32, %arg1: memref<1x8x32xf32, #tpu.memory_space<vmem>>, %arg2: memref<1x32xf32, #tpu.memory_space<vmem>>, %arg3: memref<1x1x32xf32, #tpu.memory_space<vmem>>, %arg4: memref<1x1x8xf32, #tpu.memory_space<vmem>>) attributes {dimension_semantics = [#tpu.dimension_semantics<parallel>], iteration_bounds = array<i64: 2>, scalar_prefetch = 0 : i64, scratch_operands = 0 : i64, tpu.core_type = #tpu.core_type<tc>, window_params = [{transform_indices = @transform_0, window_bounds = array<i64: 1, 8, 32>}, {pipeline_mode = #tpu.pipeline_mode<synchronous>, transform_indices = @transform_1, window_bounds = array<i64: 1, 32>}, {transform_indices = @transform_2, window_bounds = array<i64: 1, 1, 32>}, {transform_indices = @transform_3, window_bounds = array<i64: 1, 1, 8>}]} {
    %c0 = arith.constant 0 : index
    %c0_0 = arith.constant 0 : index
    %c0_1 = arith.constant 0 : index
    %0 = vector.load %arg1[%c0, %c0_0, %c0_1] : memref<1x8x32xf32, #tpu.memory_space<vmem>>, vector<1x8x32xf32>
    %c0_2 = arith.constant 0 : index
    %c0_3 = arith.constant 0 : index
    %1 = vector.load %arg2[%c0_2, %c0_3] : memref<1x32xf32, #tpu.memory_space<vmem>>, vector<1x32xf32>
    %2 = vector.shape_cast %1 : vector<1x32xf32> to vector<1x1x32xf32>
    "tpu.trace_start"() <{level = 10 : i32, message = "boh,bsh->bos"}> : () -> ()
    %cst = arith.constant dense<0.000000e+00> : vector<1x1x8xf32>
    %3 = tpu.matmul %2, %0, %cst {dimension_numbers = #tpu.dot_dimension_numbers<[2], [2], [1], [1], [0, 0, 0, 1, 1, 1], [0], [0]>} : vector<1x1x32xf32>, vector<1x8x32xf32>, vector<1x1x8xf32> -> vector<1x1x8xf32>
    "tpu.trace_stop"() : () -> ()
    %cst_4 = arith.constant dense<0xFF800000> : vector<1x1xf32>
    %4 = vector.multi_reduction <maximumf>, %3, %cst_4 [2] : vector<1x1x8xf32> to vector<1x1xf32>
    %5 = vector.shape_cast %4 : vector<1x1xf32> to vector<1x1x1xf32>
    %6 = vector.broadcast %5 : vector<1x1x1xf32> to vector<1x1x8xf32>
    %7 = arith.subf %3, %6 : vector<1x1x8xf32>
    %8 = math.exp %7 : vector<1x1x8xf32>
    %cst_5 = arith.constant dense<0.000000e+00> : vector<1x1xf32>
    %9 = vector.multi_reduction <add>, %8, %cst_5 [2] : vector<1x1x8xf32> to vector<1x1xf32>
    %10 = vector.shape_cast %9 : vector<1x1xf32> to vector<1x1x1xf32>
    %11 = vector.broadcast %10 : vector<1x1x1xf32> to vector<1x1x8xf32>
    %12 = arith.divf %8, %11 : vector<1x1x8xf32>
    "tpu.trace_start"() <{level = 10 : i32, message = "bos,bsh->boh"}> : () -> ()
    %cst_6 = arith.constant dense<0.000000e+00> : vector<1x1x32xf32>
    %13 = tpu.matmul %12, %0, %cst_6 {dimension_numbers = #tpu.dot_dimension_numbers<[2], [1], [1], [2], [0, 0, 0, 1, 1, 2], [0], [0]>} : vector<1x1x8xf32>, vector<1x8x32xf32>, vector<1x1x32xf32> -> vector<1x1x32xf32>
    "tpu.trace_stop"() : () -> ()
    %14 = vector.shape_cast %13 : vector<1x1x32xf32> to vector<1x32xf32>
    %c0_7 = arith.constant 0 : index
    %c0_8 = arith.constant 0 : index
    %c0_9 = arith.constant 0 : index
    %15 = vector.load %arg3[%c0_7, %c0_8, %c0_9] : memref<1x1x32xf32, #tpu.memory_space<vmem>>, vector<1x1x32xf32>
    %16 = vector.shape_cast %15 : vector<1x1x32xf32> to vector<1x32xf32>
    %17 = vector.shape_cast %14 : vector<1x32xf32> to vector<1x1x32xf32>
    tpu.vector_store %arg3[%c0_7, %c0_8, %c0_9], %17 {strides = array<i32>} : memref<1x1x32xf32, #tpu.memory_space<vmem>>, vector<1x1x32xf32>,
    %18 = vector.shape_cast %12 : vector<1x1x8xf32> to vector<1x8xf32>
    %c0_10 = arith.constant 0 : index
    %c0_11 = arith.constant 0 : index
    %c0_12 = arith.constant 0 : index
    %19 = vector.load %arg4[%c0_10, %c0_11, %c0_12] : memref<1x1x8xf32, #tpu.memory_space<vmem>>, vector<1x1x8xf32>
    %20 = vector.shape_cast %19 : vector<1x1x8xf32> to vector<1x8xf32>
    %21 = vector.shape_cast %18 : vector<1x8xf32> to vector<1x1x8xf32>
    tpu.vector_store %arg4[%c0_10, %c0_11, %c0_12], %21 {strides = array<i32>} : memref<1x1x8xf32, #tpu.memory_space<vmem>>, vector<1x1x8xf32>,
    return
  }
  func.func @transform_0(%arg0: i32) -> (i32, i32, i32) {
    %c0_i32 = arith.constant 0 : i32
    %c0_i32_0 = arith.constant 0 : i32
    %c0_i32_1 = arith.constant 0 : i32
    return %arg0, %c0_i32, %c0_i32_0 : i32, i32, i32
  }
  func.func @transform_1(%arg0: i32) -> (i32, i32) {
    %c0_i32 = arith.constant 0 : i32
    %c0_i32_0 = arith.constant 0 : i32
    %c0_i32_1 = arith.constant 0 : i32
    return %c0_i32, %c0_i32_0 : i32, i32
  }
  func.func @transform_2(%arg0: i32) -> (i32, i32, i32) {
    %c0_i32 = arith.constant 0 : i32
    %c0_i32_0 = arith.constant 0 : i32
    %c0_i32_1 = arith.constant 0 : i32
    return %arg0, %c0_i32, %c0_i32_0 : i32, i32, i32
  }
  func.func @transform_3(%arg0: i32) -> (i32, i32, i32) {
    %c0_i32 = arith.constant 0 : i32
    %c0_i32_0 = arith.constant 0 : i32
    %c0_i32_1 = arith.constant 0 : i32
    return %arg0, %c0_i32, %c0_i32_0 : i32, i32, i32
  }
}

</mosaic_0001>

<bundles_post_ra>
// kernel: tpu_custom_call.1
= control target key start
LH: loop header
LB: loop body
LE: loop exit
PB: predicated region body
PF: predicated region fallthrough
CT: control target
= control target key end

     0   :  { %9 = vsyncpa [#allocation3], 0  ;;  %s902_s0 = inlined_call_operand.hbm [shape: f32[2,8,32], index: 0, kind: input, shape index: {}]   ;;  %s903_s1 = inlined_call_operand.vmem [shape: f32[1,32], index: 1, kind: input, shape index: {}]   ;;  %s904_s2 = inlined_call_operand.hbm [shape: f32[2,1,32], index: 2, kind: output, shape index: {0}]   ;;  %s905_s3 = inlined_call_operand.hbm [shape: f32[2,1,8], index: 3, kind: output, shape index: {1}]  }
   0x1   :  { %11 = vsyncpa [#allocation3 + $0x1], 0 }
   0x2   :  { %12 = vsyncpa [#allocation4], 0 }
   0x3   :  { %14 = vsyncpa [#allocation4 + $0x1], 0 }
   0x4   :  { %15 = vsyncpa [#allocation7], 0 }
   0x5   :  { %17 = vsyncpa [#allocation7 + $0x1], 0  ;;  %s721_s12 = smov 0   ;;  %s723_s13 = smov 0  }
   0x6   :  { %s725_s14 = smov 0   ;;  %s727_s15 = smov 0  }
   0x7 LB: > { %s742_s16 = sadd.s32 4294967295, %s694_s15   ;;  %s487_s17 = sadd.s32 4294967294, %s694_s15   ;;  %s694_s15 = sphi %s727_s15, %s922_s15   ;;  %s690_s14 = sphi %s725_s14, %s921_s14   ;;  %s686_s13 = sphi %s723_s13, %s920_s13   ;;  %s682_s12 = sphi %s721_s12, %s919_s12  }
   0x8   : > { %s746_s18 = sadd.s32 1, %s694_s15   ;;  %s30_s19 = sadd.s32 1, %s690_s14 }
   0x9   : > { %s27_s20 = ssub.s32 %s694_s15, %s746_s18  ;;  %p37_p0 = scmp.ne.s32.totalorder %s690_s14, %s686_s13 }
   0xa   : > { %p28_p1 = scmp.eq.s32.totalorder %s27_s20, 0  ;;  %p38_p2 = scmp.eq.s32.totalorder %s694_s15, 0 }
   0xb   : > { %p43_p3 = scmp.ne.s32.totalorder %s686_s13, %s682_s12  ;;  %p44_p4 = scmp.eq.s32.totalorder %s742_s16, 0 }
   0xc   : > { %s758_s21 = scalar_select %p28_p1, %s690_s14, %s30_s19  }
   0xd   : > { %p760_p5 = por %p38_p2, %p37_p0  ;;  %p764_p6 = por %p44_p4, %p43_p3 }
   0xe   : > { %p88_p7 = scmp.eq.s32.totalorder %s742_s16, 1  ;;  %p94_p8 = scmp.eq.s32.totalorder %s487_s17, 1 }
   0xf   : > { %s909_s23 = scalar_select %p764_p6, 1, 0 }
  0x10   : > { %p532_p10 = scmp.lt.s32.totalorder %s694_s15, 2  ;;  %p771_p11 = por %p88_p7, %p37_p0 }
  0x11   : > { %p775_p12 = por %p94_p8, %p43_p3  ;;  %s143_s26 = sand.u32 1, %s690_s14  }
  0x12   : > { %s910_s24 = scalar_select %p771_p11, 1, 0 }
  0x13   : > { %s911_s25 = scalar_select %p775_p12, 1, 0 }
  0x14   : > { %s491_s27 = sshll.u32 %s694_s15, 7  ;;  %s490_s28 = sshll.u32 %s143_s26, 3 }
  0x15   : > { %s784_s4 = scalar_lea.hbm %s902_s0, %s491_s27  ;;  %s147_s5 = scalar_lea.vmem [#allocation2], %s490_s28 }
  0x16   : > { %s154_s6 = sshll.u32 %s147_s5, 4  ;;  %p788_p13 = pnand %p532_p10, %p760_p5  ;;  %s792_s6 = int_to_ptr.vmem [resolvable:$true] %s154_s6 }
  0x17   : > { %s144_s8 = scalar_lea.sflag [#allocation3], %s143_s26  ;;  %s572_s9 = scalar_lea.hbm %s784_s4, 128 }
  0x18   : > { %p573_p2 = scmp.ne.s32.totalorder %s784_s4, %s572_s9  ;;  %p574_p3 = pneg %p788_p13 }
  0x19   : > { %s577_s17 = scalar_lea.hbm %s902_s0, 256  ;;  %p578_p5 = scmp.lt.s32.totalorder %s784_s4, %s902_s0 }
  0x1a   : > { %p575_p4 = pnand %p574_p3, %p573_p2  ;;  %p579_p8 = scmp.lt.s32.totalorder %s577_s17, %s572_s9 }
  0x1c   : > { %p576_p7 = pneg %p575_p4  ;;  %p580_p10 = por %p579_p8, %p578_p5 }
  0x1e   : > { %p581_p9 = pnand %p580_p10, %p576_p7 }
  0x20   : > { %584 = shalt.err (!%p581_p9)
}
  0x21   : > { %s585_s22 = scalar_lea.vmem %s792_s6, 128  ;;  %s696_s26 = smov [#allocation2]  }
  0x22   : > { %p586_p0 = scmp.ne.s32.totalorder %s792_s6, %s585_s22  ;;  %s590_s27 = sshll.u32 %s696_s26, 4  ;;  %s591_s27 = int_to_ptr.vmem [resolvable:$false] %s590_s27 }
  0x23   : > { %s592_s28 = scalar_lea.vmem %s591_s27, 256  ;;  %p593_p4 = scmp.lt.s32.totalorder %s792_s6, %s591_s27 }
  0x24   : > { %p588_p1 = pnand %p586_p0, %p574_p3  ;;  %p594_p12 = scmp.lt.s32.totalorder %s592_s28, %s585_s22 }
  0x26   : > { %p589_p2 = pneg %p588_p1  ;;  %p595_p11 = por %p594_p12, %p593_p4 }
  0x28   : > { %p596_p6 = pnand %p595_p11, %p589_p2 }
  0x2a   : > { %599 = shalt.err (!%p596_p6)
}
  0x2b   : > { %524 = dma.hbm_to_vmem [thread:$0]  (!%p788_p13), %s784_s4, 128, %s792_s6, %s144_s8  }
  0x2c   : > { %p913_p9 = scmp.lt.s32.totalorder %s694_s15, 3  ;;  %p914_p7 = scmp.ge.s32.totalorder %s694_s15, 1 }
  0x2e   : > { %p160_p0 = pnand %p914_p7, %p913_p9 }
  0x2f   : > { %s819_s29 = sand.u32 (!%p160_p0), 1, %s686_s13   ;;  %p915_p6 = scmp.ne.s32.totalorder (!%p160_p0), %s909_s23, 0 }
  0x30   : > { %163 = sbr.rel (%p160_p0) target bundleno = 772 (0x304), region = 28  ;;  %s493_s30 = sshll.u32 (!%p160_p0), %s819_s29, 3 }
  0x31   : > { %s166_s5 = scalar_lea.sflag (!%p160_p0), [#allocation3], %s819_s29  ;;  %s169_s9 = scalar_lea.vmem (!%p160_p0), [#allocation2], %s493_s30 }
  0x35   : > { %669 = dma.done.wait (%p915_p6), %s166_s5, 128  }
  0x36   : > { %671 = vsyncadd (%p915_p6), %s166_s5, 4294967168  ;;  %v697_v0 = vmov 0.0   ;;  %vm698_vm0 = vmmov 0   ;;  %vm197_vm1 = vcmask 261120   ;;  %v195_v1 = vld [vmem:[%s169_s9] sm:$0xff]  ;;  %vm274_vm2 = vcmask 57344  }
  0x37   : > { %505 = vmatprep.subr.mxu0 %v697_v0  ;;  %507 = vmatprep.mubr.msk.f32.mxu0 %vm698_vm0, %v697_v0  ;;  %v196_v2 = vld [vmem:[%s903_s1] sm:$0x1]  ;;  %vm286_vm3 = vcmask 64512   ;;  %s194_s23 = scalar_lea.vmem [#allocation6], %s819_s29  ;;  %s497_s7 = sshll.u32 %s742_s16, 4 }
  0x38   : > { %510 = vmatprep.subr.mxu1 %v697_v0  ;;  %512 = vmatprep.mubr.msk.f32.mxu1 %vm698_vm0, %v697_v0  ;;  %s391_s11 = scalar_lea.hbm %s905_s3, %s497_s7  ;;  %s393_s17 = sshll.u32 %s194_s23, 4  ;;  %s394_s17 = int_to_ptr.vmem [resolvable:$true] %s393_s17 }
  0x39   : > { %506 = vmatpush3.xpose.msk.msra.mxu0 %vm197_vm1, %v195_v1  ;;  %511 = vmatpush3.msra.mxu1 %v195_v1  ;;  %s368_s19 = scalar_lea.sflag [#allocation7], %s819_s29  ;;  %s600_s20 = scalar_lea.vmem %s394_s17, 16 }
  0x3a   : > { %p601_p11 = scmp.ne.s32.totalorder %s394_s17, %s600_s20  ;;  %p916_p12 = scmp.ne.s32.totalorder %s910_s24, 0 }
  0x3b   : > { %s699_s22 = smov [#allocation6]  }
  0x3c   : > { %508 = vmatmul.mubr.msk.f32.vlgmr.msra.gmra.mxu0 %vm197_vm1, %v196_v2  ;;  %p602_p13 = pnand %p601_p11, %p916_p12  ;;  %s604_s26 = sshll.u32 %s699_s22, 4  ;;  %s605_s26 = int_to_ptr.vmem [resolvable:$false] %s604_s26 }
  0x3d   : > { %s606_s27 = scalar_lea.vmem %s605_s26, 32  ;;  %p607_p3 = scmp.lt.s32.totalorder %s394_s17, %s605_s26 }
  0x3e   : > { %p603_p1 = pneg %p602_p13  ;;  %p608_p5 = scmp.lt.s32.totalorder %s606_s27, %s600_s20 }
  0x40   : > { %p609_p8 = por %p608_p5, %p607_p3 }
  0x42   : > { %p610_p10 = pnand %p609_p8, %p603_p1 }
  0xfc   : > { %v270_v3 = vpop.f32.mrf.mxu0 }
  0xfd   : > { %v275_v4 = vsel %vm274_vm2, %v270_v3, -inf }
  0xfe   : > { %276 = vmax.xlane.f32.xlu0 %v275_v4  ;;  %v509_v5 = vpop.f32.mrf.mxu0 }
 0x187   : > { %v277_v6 = vpop.xlane.xlu0 %276 }
 0x188   : > { %v278_v7 = vsub.f32 %v270_v3, %v277_v6 }
 0x18a   : > { %v279_v8 = vmul.f32 1.442695, %v278_v7 }
 0x18c   : > { %568 = vpow2.f32 %v279_v8 }
 0x199   : > { %v569_v9 = vpop.eup %568 }
 0x19a   : > { %v281_v10 = vsel %vm274_vm2, %v569_v9, 0.0 }
 0x19b   : > { %282 = vadd.xlane.f32.xlu0 %v281_v10 }
 0x224   : > { %v283_v11 = vpop.xlane.xlu0 %282 }
 0x225   : > { %570 = vrcp.f32 %v283_v11 }
 0x232   : > { %v571_v12 = vpop.eup %570 }
 0x233   : > { %v285_v13 = vmul.f32 %v571_v12, %v569_v9 }
 0x235   : > { %513 = vmatmul.mubr.msk.f32.vlgmr.msra.gmra.mxu1 %vm286_vm3, %v285_v13  ;;  %362 = vst.msk [vmem:[%s194_s23] sm:$0x1] %vm274_vm2, %v285_v13 }
 0x236   : > { %613 = shalt.err (!%p610_p10)
}
 0x237   : > { %s614_s28 = scalar_lea.hbm %s391_s11, 16  ;;  %s618_s9 = scalar_lea.hbm %s905_s3, 32 }
 0x238   : > { %p615_p2 = scmp.ne.s32.totalorder %s391_s11, %s614_s28  ;;  %p619_p7 = scmp.lt.s32.totalorder %s391_s11, %s905_s3 }
 0x239   : > { %p620_p0 = scmp.lt.s32.totalorder %s618_s9, %s614_s28 }
 0x23a   : > { %p616_p4 = pnand %p615_p2, %p916_p12 }
 0x23b   : > { %p621_p6 = por %p620_p0, %p619_p7 }
 0x23c   : > { %p617_p9 = pneg %p616_p4 }
 0x23e   : > { %p622_p11 = pnand %p621_p6, %p617_p9 }
 0x240   : > { %625 = shalt.err (!%p622_p11)
}
 0x241   : > { %518 = dma.vmem_to_hbm [thread:$0]  (%p916_p12), %s394_s17, 16, %s391_s11, %s368_s19   ;;  %vm360_vm4 = vcmask 253952  }
 0x242   : > { %s188_s23 = scalar_lea.vmem [#allocation5], %s819_s29  ;;  %s859_s22 = scalar_lea.hbm %s904_s2, %s497_s7 }
 0x243   : > { %s380_s8 = sshll.u32 %s188_s23, 4  ;;  %s364_s26 = scalar_lea.sflag [#allocation4], %s819_s29  ;;  %s861_s8 = int_to_ptr.vmem [resolvable:$true] %s380_s8 }
 0x244   : > { %s626_s27 = scalar_lea.vmem %s861_s8, 16  ;;  %s700_s16 = smov [#allocation5]  }
 0x245   : > { %p627_p13 = scmp.ne.s32.totalorder %s861_s8, %s626_s27  ;;  %s630_s11 = sshll.u32 %s700_s16, 4  ;;  %s631_s11 = int_to_ptr.vmem [resolvable:$false] %s630_s11 }
 0x246   : > { %s632_s17 = scalar_lea.vmem %s631_s11, 32  ;;  %p633_p5 = scmp.lt.s32.totalorder %s861_s8, %s631_s11 }
 0x247   : > { %p628_p1 = pnand %p627_p13, %p916_p12  ;;  %p634_p8 = scmp.lt.s32.totalorder %s632_s17, %s626_s27 }
 0x249   : > { %p629_p3 = pneg %p628_p1  ;;  %p635_p10 = por %p634_p8, %p633_p5 }
 0x24b   : > { %p636_p2 = pnand %p635_p10, %p629_p3 }
 0x2f5   : > { %v356_v14 = vpop.f32.mrf.mxu1 }
 0x2f6   : > { %361 = vst.msk [vmem:[%s188_s23] sm:$0x1] %vm360_vm4, %v356_v14 }
 0x2f7   : > { %v514_v15 = vpop.f32.mrf.mxu1 }
 0x2f8   : > { %639 = shalt.err (!%p636_p2)
}
 0x2f9   : > { %s640_s7 = scalar_lea.hbm %s859_s22, 16  ;;  %s644_s28 = scalar_lea.hbm %s904_s2, 32 }
 0x2fa   : > { %p641_p4 = scmp.ne.s32.totalorder %s859_s22, %s640_s7  ;;  %p645_p0 = scmp.lt.s32.totalorder %s859_s22, %s904_s2 }
 0x2fb   : > { %p646_p6 = scmp.lt.s32.totalorder %s644_s28, %s640_s7 }
 0x2fc   : > { %p642_p9 = pnand %p641_p4, %p916_p12 }
 0x2fd   : > { %p647_p11 = por %p646_p6, %p645_p0 }
 0x2fe   : > { %p643_p7 = pneg %p642_p9 }
 0x300   : > { %p648_p13 = pnand %p647_p11, %p643_p7 }
 0x302   : > { %651 = shalt.err (!%p648_p13)
}
 0x303   : > { %517 = dma.vmem_to_hbm [thread:$0]  (%p916_p12), %s861_s8, 16, %s859_s22, %s364_s26  }
 0x304 PF: > { %s405_s9 = sand.u32 1, %s682_s12   ;;  %p917_p1 = scmp.ne.s32.totalorder %s911_s25, 0 }
 0x305   : > { %p918_p3 = scmp.ge.s32.totalorder %s694_s15, 2  ;;  %s406_s4 = scalar_lea.sflag [#allocation4], %s405_s9 }
 0x307   : > { %p526_p5 = pnand %p918_p3, %p917_p1 }
 0x309   : > { %p527_p8 = pneg %p526_p5 }
 0x30b   : > { %673 = dma.done.wait (%p527_p8), %s406_s4, 16  }
 0x30c   : > { %675 = vsyncadd (%p527_p8), %s406_s4, 4294967280  ;;  %s414_s6 = scalar_lea.sflag [#allocation7], %s405_s9 }
 0x30d   : > { %677 = dma.done.wait (%p527_p8), %s414_s6, 16  }
 0x30e   : > { %679 = vsyncadd (%p527_p8), %s414_s6, 4294967280  ;;  %p20_p12 = scmp.ge.s32.totalorder %s746_s18, 4   ;;  %s919_s12 = smov %s686_s13 }
 0x30f   : > { %s920_s13 = smov %s690_s14  ;;  %s921_s14 = smov %s758_s21 }
 0x310   : > { %s922_s15 = smov %s746_s18  ;;  %22 = sbr.rel (!%p20_p12) target bundleno = 7 (0x7), region = 90 }
 0x315   :  { %418 = vsyncpa [#allocation3], 1 }
 0x316   :  { %420 = vsyncpa [#allocation3 + $0x1], 1 }
 0x317   :  { %421 = vsyncpa [#allocation4], 1 }
 0x318   :  { %423 = vsyncpa [#allocation4 + $0x1], 1 }
 0x319   :  { %424 = vsyncpa [#allocation7], 1 }
 0x31a   :  { %426 = vsyncpa [#allocation7 + $0x1], 1 }

</bundles_post_ra>
